<compile_context>
chip_gen: v5e
topology: v5e:2x2
jax: 0.10.0
libtpu: 0.0.40
codegen_flags: <defaults>
</compile_context>

<pallas_src>
import math

import jax
import jax.numpy as jnp
from jax.experimental import pallas as pl
from jax.experimental.pallas import tpu as pltpu


# ----------------------------------------------------------------------------
# Pallas kernel: s_raw[1, N] = v^T @ A_hat^T   (tiled, f32 accumulation)
# finalize:      s[1, N]     = s_raw * d_row   (D^{-1/2} row scaling)
# ----------------------------------------------------------------------------
def _gcn_score_kernel(at_ref, v_ref, di_ref, o_ref, acc_ref):
    k = pl.program_id(1)

    @pl.when(k == 0)
    def _init():
        acc_ref[...] = jnp.zeros_like(acc_ref)

    a = at_ref[...].astype(jnp.float32)            # (TK, TM) bf16 -> f32 in VMEM
    v = v_ref[...]                                 # (TK, 1)  f32 (normalization folded in)
    # VPU multiply (lane-broadcast of v) + cross-sublane reduce -> lane-dense (1, TM)
    acc_ref[...] += jnp.sum(a * v, axis=0, keepdims=True)

    @pl.when(k == pl.num_programs(1) - 1)
    def _finalize():
        o_ref[...] = acc_ref[...] * di_ref[...]    # scale rows by D^{-1/2}, lane-dense store


def _gcn_score_matvec(a_t_bf16, v_col, d_row, *, tm=128, tk=128):
    """s_row (1, Np) = d_row * (v_col^T @ A_hat^T), tiled over (row tiles, K tiles)."""
    npad = a_t_bf16.shape[0]
    assert npad % tm == 0 and npad % tk == 0, "padded N must be a tile multiple"
    grid = (npad // tm, npad // tk)

    # Per-step VMEM (double-buffered inputs + output + accumulator).  For large
    # tiles (512-1024, recommended for big N) raise the scoped limit explicitly,
    # staying well under v7x's 64 MiB physical VMEM.
    itemsize = jnp.dtype(a_t_bf16.dtype).itemsize
    vmem_need = 2 * (tk * tm * itemsize + tk * 4 + 2 * tm * 4) + tm * 4
    cp_kwargs = dict(dimension_semantics=("parallel", "arbitrary"))
    if vmem_need > 16 * 1024 * 1024:
        cp_kwargs["vmem_limit_bytes"] = min(int(vmem_need * 2), 48 * 1024 * 1024)

    return pl.pallas_call(
        _gcn_score_kernel,
        out_shape=jax.ShapeDtypeStruct((1, npad), jnp.float32),
        grid_spec=pltpu.PrefetchScalarGridSpec(
            num_scalar_prefetch=0,
            grid=grid,
            in_specs=[
                pl.BlockSpec((tk, tm), lambda i, k: (k, i)),   # A_hat^T tile (bf16)
                pl.BlockSpec((tk, 1), lambda i, k: (k, 0)),    # v tile (f32 column)
                pl.BlockSpec((1, tm), lambda i, k: (0, i)),    # D^{-1/2} row tile
            ],
            out_specs=pl.BlockSpec((1, tm), lambda i, k: (0, i)),  # lane-dense score row
            scratch_shapes=[pltpu.VMEM((1, tm), jnp.float32)],
        ),
        compiler_params=pltpu.CompilerParams(**cp_kwargs),
    )(a_t_bf16, v_col, d_row)


def _round_up(a, m):
    return ((a + m - 1) // m) * m


# ----------------------------------------------------------------------------
# GCNConv(in_channels, 1) score (wrapper glue + Pallas matvec)
# ----------------------------------------------------------------------------
def gcn_score(x, edge_index, weight, bias, *, tile=128):
    """Returns the (N,) GCN score  D^{-1/2} A_hat D^{-1/2} (X W) + b."""
    n, _ = x.shape
    src, dst = edge_index[0], edge_index[1]
    npad = _round_up(n, tile)

    # O(E) degree (in-degree + 1 self-loop), consistent with the dense matrix below.
    deg = jnp.zeros((n,), jnp.float32).at[dst].add(1.0) + 1.0
    d = jax.lax.rsqrt(deg)                                          # (n,)

    # Transposed dense adjacency with self loops: A^T[j, i] = #edges j -> i.
    # bf16 is exact for small integer counts; halves HBM traffic of the matvec.
    # TODO(synk): if edge_index already contains self-loops this adds another
    #             (weight 2), unlike PyG's add_remaining_self_loops.
    a_t = jnp.zeros((npad, npad), jnp.float32)
    a_t = a_t.at[src, dst].add(1.0)
    ar = jnp.arange(n)
    a_t = a_t.at[ar, ar].add(1.0)
    a_t = a_t.astype(jnp.bfloat16)

    # Folded normalization: v = D^{-1/2} (X @ W).  Padded rows are zero.
    h = (x.astype(jnp.float32) @ weight.astype(jnp.float32))[:, 0]  # (n,)
    v = d * h
    v_col = jnp.zeros((npad, 1), jnp.float32).at[:n, 0].set(v)
    d_row = jnp.ones((1, npad), jnp.float32).at[0, :n].set(d)       # pad with 1 (no inf*0)

    s_row = _gcn_score_matvec(a_t, v_col, d_row, tm=tile, tk=tile)  # (1, npad)
    return s_row[0, :n] + jnp.asarray(bias, jnp.float32).reshape(())


# ----------------------------------------------------------------------------
# SAGPool forward (JAX glue around the Pallas score kernel)
# ----------------------------------------------------------------------------
def sag_pool_forward(x, edge_index, weight, bias, ratio=0.8, batch=None, *, tile=128):
    """Returns (x_pooled, edge_index_filtered, edge_attr, batch_pooled, perm).

    Single-graph semantics (batch = all zeros), matching SAGPool.forward when
    batch is None.  edge_index_filtered keeps the original edge count (static
    shapes in JAX); dropped edges are marked with -1 in both rows and pushed
    to the end.
    """
    n, _ = x.shape
    if batch is None:
        batch = jnp.zeros((n,), dtype=edge_index.dtype)
    src, dst = edge_index[0], edge_index[1]

    # --- GCNConv score (Pallas hot path) ---
    score = gcn_score(x, edge_index, weight, bias, tile=tile)       # (N,)

    # --- top-k per graph (single graph); torch_geometric: k = ceil(ratio*N)
    # TODO(synk): batch-aware top-k (segment-wise) for multiple graphs per call;
    #             tie-breaking can differ from torch.topk on exactly-tied scores.
    k = int(math.ceil(ratio * n))
    perm = jnp.argsort(-score)[:k]

    # --- gather + tanh gate (fused by XLA; no separate Pallas launch needed) ---
    x_pooled = x[perm] * jnp.tanh(score[perm])[:, None]             # (k, C)
    batch_pooled = batch[perm]

    # --- filter_adj: keep edges with both endpoints selected, remap node ids.
    # TODO(synk): torch returns a compacted variable-length edge list; JAX needs
    # static shapes, so invalid edges are left as (-1, -1) and pushed to the end.
    keep_mask = jnp.zeros((n,), dtype=bool).at[perm].set(True)
    new_id = jnp.full((n,), -1, dtype=edge_index.dtype).at[perm].set(
        jnp.arange(k, dtype=edge_index.dtype))
    edge_keep = keep_mask[src] & keep_mask[dst]
    remapped = jnp.where(edge_keep[None, :], new_id[edge_index], -1)
    order = jnp.argsort(~edge_keep)                                 # valid edges first
    edge_index_f = remapped[:, order]
    edge_attr_f = None

    return x_pooled, edge_index_f, edge_attr_f, batch_pooled, perm


# ----------------------------------------------------------------------------
# Demo
# ----------------------------------------------------------------------------
if __name__ == "__main__":
    key = jax.random.PRNGKey(0)
    k_x, k_w = jax.random.split(key)

    in_channels = 16
    num_nodes = 256
    ratio = 0.8

    # node features (N, C)
    x = jax.random.normal(k_x, (num_nodes, in_channels), dtype=jnp.float32)

    # bidirectional ring graph: 2*N directed edges
    fwd = jnp.stack([jnp.arange(num_nodes),
                     (jnp.arange(num_nodes) + 1) % num_nodes])
    edge_index = jnp.concatenate([fwd, fwd[::-1]], axis=1).astype(jnp.int32)  # (2, 512)

    # GCNConv(in_channels, 1) parameters: glorot weight, zero bias (deterministic).
    limit = math.sqrt(6.0 / (in_channels + 1))
    weight = jax.random.uniform(k_w, (in_channels, 1), jnp.float32, -limit, limit)
    bias = jnp.zeros((1,), dtype=jnp.float32)

    # --- sanity check of the Pallas score path against a plain-JAX reference ---
    a_ref = jnp.zeros((num_nodes, num_nodes), jnp.float32)
    a_ref = a_ref.at[edge_index[1], edge_index[0]].add(1.0)
    a_ref = a_ref + jnp.eye(num_nodes, dtype=jnp.float32)
    dinv = jax.lax.rsqrt(a_ref.sum(axis=1, keepdims=True))
    score_ref = (dinv * (a_ref @ (dinv * (x @ weight))))[:, 0] + bias[0]
    score_pal = gcn_score(x, edge_index, weight, bias)
    jax.block_until_ready(score_pal)
    assert jnp.allclose(score_pal, score_ref, rtol=1e-4, atol=1e-4), "score mismatch"

    # --- full SAGPool forward ---
    out = sag_pool_forward(x, edge_index, weight, bias, ratio=ratio, batch=None)
    x_pooled, edge_index_f, edge_attr_f, batch_pooled, perm = out
    jax.block_until_ready((x_pooled, edge_index_f, batch_pooled, perm))

    kk = math.ceil(ratio * num_nodes)
    assert x_pooled.shape == (kk, in_channels)
    assert edge_index_f.shape == edge_index.shape
    assert perm.shape == (kk,)
    print("KERNEL_OK")
</pallas_src>

<mosaic_0001>
module attributes {stable_mosaic.version = 11 : i64} {
  func.func @_gcn_score_kernel(%arg0: i32, %arg1: i32, %arg2: memref<128x128xbf16, #tpu.memory_space<vmem>>, %arg3: memref<128x1xf32, #tpu.memory_space<vmem>>, %arg4: memref<1x128xf32, #tpu.memory_space<vmem>>, %arg5: memref<1x128xf32, #tpu.memory_space<vmem>>, %arg6: memref<1x128xf32, #tpu.memory_space<vmem>>) attributes {dimension_semantics = [#tpu.dimension_semantics<parallel>, #tpu.dimension_semantics<arbitrary>], iteration_bounds = array<i64: 2, 2>, scalar_prefetch = 0 : i64, scratch_operands = 1 : i64, tpu.core_type = #tpu.core_type<tc>, window_params = [{transform_indices = @transform_0, window_bounds = array<i64: 128, 128>}, {transform_indices = @transform_1, window_bounds = array<i64: 128, 1>}, {transform_indices = @transform_2, window_bounds = array<i64: 1, 128>}, {transform_indices = @transform_3, window_bounds = array<i64: 1, 128>}]} {
    %c0_i32 = arith.constant 0 : i32
    %0 = arith.cmpi eq, %arg1, %c0_i32 : i32
    %1 = arith.extui %0 : i1 to i32
    %c0_i32_0 = arith.constant 0 : i32
    %2 = arith.cmpi ne, %1, %c0_i32_0 : i32
    scf.if %2 {
      %cst_9 = arith.constant 0.000000e+00 : f32
      %16 = vector.broadcast %cst_9 : f32 to vector<1x128xf32>
      %c0_10 = arith.constant 0 : index
      %c0_11 = arith.constant 0 : index
      %17 = vector.load %arg6[%c0_10, %c0_11] : memref<1x128xf32, #tpu.memory_space<vmem>>, vector<1x128xf32>
      tpu.vector_store %arg6[%c0_10, %c0_11], %16 {strides = array<i32>} : memref<1x128xf32, #tpu.memory_space<vmem>>, vector<1x128xf32>,
    } else {
    }
    %c0 = arith.constant 0 : index
    %c0_1 = arith.constant 0 : index
    %3 = vector.load %arg2[%c0, %c0_1] : memref<128x128xbf16, #tpu.memory_space<vmem>>, vector<128x128xbf16>
    %4 = arith.extf %3 : vector<128x128xbf16> to vector<128x128xf32>
    %c0_2 = arith.constant 0 : index
    %c0_3 = arith.constant 0 : index
    %5 = vector.load %arg3[%c0_2, %c0_3] : memref<128x1xf32, #tpu.memory_space<vmem>>, vector<128x1xf32>
    %c0_4 = arith.constant 0 : index
    %c0_5 = arith.constant 0 : index
    %6 = vector.load %arg6[%c0_4, %c0_5] : memref<1x128xf32, #tpu.memory_space<vmem>>, vector<1x128xf32>
    %7 = vector.broadcast %5 : vector<128x1xf32> to vector<128x128xf32>
    %8 = arith.mulf %4, %7 : vector<128x128xf32>
    %cst = arith.constant dense<0.000000e+00> : vector<128xf32>
    %9 = vector.multi_reduction <add>, %8, %cst [0] : vector<128x128xf32> to vector<128xf32>
    %10 = vector.shape_cast %9 : vector<128xf32> to vector<1x128xf32>
    %11 = arith.addf %6, %10 : vector<1x128xf32>
    %c0_6 = arith.constant 0 : index
    %c0_7 = arith.constant 0 : index
    %12 = vector.load %arg6[%c0_6, %c0_7] : memref<1x128xf32, #tpu.memory_space<vmem>>, vector<1x128xf32>
    tpu.vector_store %arg6[%c0_6, %c0_7], %11 {strides = array<i32>} : memref<1x128xf32, #tpu.memory_space<vmem>>, vector<1x128xf32>,
    %c1_i32 = arith.constant 1 : i32
    %13 = arith.cmpi eq, %arg1, %c1_i32 : i32
    %14 = arith.extui %13 : i1 to i32
    %c0_i32_8 = arith.constant 0 : i32
    %15 = arith.cmpi ne, %14, %c0_i32_8 : i32
    scf.if %15 {
      %c0_9 = arith.constant 0 : index
      %c0_10 = arith.constant 0 : index
      %16 = vector.load %arg6[%c0_9, %c0_10] : memref<1x128xf32, #tpu.memory_space<vmem>>, vector<1x128xf32>
      %c0_11 = arith.constant 0 : index
      %c0_12 = arith.constant 0 : index
      %17 = vector.load %arg4[%c0_11, %c0_12] : memref<1x128xf32, #tpu.memory_space<vmem>>, vector<1x128xf32>
      %18 = arith.mulf %16, %17 : vector<1x128xf32>
      %c0_13 = arith.constant 0 : index
      %c0_14 = arith.constant 0 : index
      %19 = vector.load %arg5[%c0_13, %c0_14] : memref<1x128xf32, #tpu.memory_space<vmem>>, vector<1x128xf32>
      tpu.vector_store %arg5[%c0_13, %c0_14], %18 {strides = array<i32>} : memref<1x128xf32, #tpu.memory_space<vmem>>, vector<1x128xf32>,
    } else {
    }
    return
  }
  func.func @transform_0(%arg0: i32, %arg1: i32) -> (i32, i32) {
    %c0_i32 = arith.constant 0 : i32
    return %arg1, %arg0 : i32, i32
  }
  func.func @transform_1(%arg0: i32, %arg1: i32) -> (i32, i32) {
    %c0_i32 = arith.constant 0 : i32
    %c0_i32_0 = arith.constant 0 : i32
    return %arg1, %c0_i32 : i32, i32
  }
  func.func @transform_2(%arg0: i32, %arg1: i32) -> (i32, i32) {
    %c0_i32 = arith.constant 0 : i32
    %c0_i32_0 = arith.constant 0 : i32
    return %c0_i32, %arg0 : i32, i32
  }
  func.func @transform_3(%arg0: i32, %arg1: i32) -> (i32, i32) {
    %c0_i32 = arith.constant 0 : i32
    %c0_i32_0 = arith.constant 0 : i32
    return %c0_i32, %arg0 : i32, i32
  }
}

</mosaic_0001>

<bundles_post_ra>
// kernel: tpu_custom_call.1
= control target key start
LH: loop header
LB: loop body
LE: loop exit
PB: predicated region body
PF: predicated region fallthrough
CT: control target
= control target key end

     0   :  { %s1120_s0 = inlined_call_operand.vmem [shape: bf16[256,256], index: 0, kind: input, shape index: {}]   ;;  %s1121_s1 = inlined_call_operand.vmem [shape: f32[256,1], index: 1, kind: input, shape index: {}]   ;;  %s1122_s2 = inlined_call_operand.vmem [shape: f32[1,256], index: 2, kind: input, shape index: {}]   ;;  %s1123_s3 = inlined_call_operand.hbm [shape: f32[1,256], index: 3, kind: output, shape index: {}]  }
   0x1   :  { %1124 = sst [smem:[#allocation7_spill]] %s1120_s0 }
   0x2   :  { %8 = vsyncpa [#allocation5], 0 }
   0x3   :  { %10 = vsyncpa [#allocation5 + $0x1], 0  ;;  %s896_s12 = smov 0   ;;  %s898_s13 = smov 0  }
   0x4   :  { %s900_s14 = smov 0   ;;  %s902_s15 = smov 0  }
   0x5   :  { %s904_s16 = smov 0   ;;  %s906_s17 = smov 0  }
   0x6   :  { %s908_s18 = smov 0   ;;  %s910_s19 = smov 0  }
   0x7   :  { %s912_s20 = smov 0   ;;  %s914_s21 = smov 0  }
   0x8 LB: > { %s614_s22 = sadd.s32 4294967295, %s872_s21   ;;  %s615_s23 = sadd.s32 4294967294, %s872_s21   ;;  %s872_s21 = sphi %s914_s21, %s16_s21   ;;  %s868_s20 = sphi %s912_s20, %s1137_s20   ;;  %s864_s19 = sphi %s910_s19, %s1136_s19   ;;  %s860_s18 = sphi %s908_s18, %s1135_s18   ;;  %s856_s17 = sphi %s906_s17, %s1134_s17   ;;  %s852_s16 = sphi %s904_s16, %s1133_s16   ;;  %s848_s15 = sphi %s902_s15, %s1132_s15   ;;  %s844_s14 = sphi %s900_s14, %s1131_s14   ;;  %s840_s13 = sphi %s898_s13, %s1130_s13   ;;  %s836_s12 = sphi %s896_s12, %s1129_s12  }
   0x9   : > { %s25_s24 = sadd.s32 1, %s864_s19  ;;  %s28_s25 = sadd.s32 1, %s868_s20 }
   0xa   : > { %p26_p0 = scmp.ge.s32.totalorder %s25_s24, 2  ;;  %s37_s26 = sadd.s32 1, %s852_s16 }
   0xb   : > { %p44_p1 = scmp.ne.s32.totalorder %s852_s16, %s848_s15  ;;  %p45_p2 = scmp.eq.s32.totalorder %s872_s21, 0 }
   0xc   : > { %s1139_s24 = smov (%p26_p0, %s25_s24), 0  ;;  %s1141_s25 = smov (!%p26_p0, %s28_s25), %s868_s20 }
   0xd   : > { %s32_s27 = ssub.s32 %s864_s19, %s1139_s24  ;;  %p959_p3 = por %p45_p2, %p44_p1 }
   0xe   : > { %p30_p4 = scmp.ge.s32.totalorder %s1141_s25, 2  ;;  %s115_s29 = sadd.s32 1, %s844_s14 }
   0xf   : > { %p125_p5 = scmp.ne.s32.totalorder %s844_s14, %s840_s13  ;;  %p126_p6 = scmp.eq.s32.totalorder %s614_s22, 3 }
  0x10   : > { %s1143_s25 = smov (%p30_p4, %s1141_s25), 0  ;;  %p131_p8 = scmp.ne.s32.totalorder %s840_s13, %s836_s12 }
  0x11   : > { %p968_p7 = por %p126_p6, %p125_p5  ;;  %s33_s4 = ssub.s32 %s868_s20, %s1143_s25 }
  0x12   : > { %p132_p9 = scmp.eq.s32.totalorder %s615_s23, 3  ;;  %s34_s5 = sor.u32 %s33_s4, %s32_s27 }
  0x13   : > { %p113_p10 = scmp.eq.s32.totalorder %s33_s4, 0  ;;  %p35_p11 = scmp.eq.s32.totalorder %s34_s5, 0 }
  0x14   : > { %p976_p12 = por %p132_p9, %p131_p8  ;;  %p617_p13 = scmp.ge.s32.totalorder %s872_s21, 4 }
  0x15   : > { %s981_s7 = scalar_select %p113_p10, %s844_s14, %s115_s29  }
  0x16   : > { %s984_s8 = scalar_select %p35_p11, %s852_s16, %s37_s26  }
  0x17   : > { %148 = sbr.rel (%p617_p13) target bundleno = 54 (0x36), region = 16 }
  0x1c   : > { %151 = sbr.rel (!%p959_p3) target bundleno = 54 (0x36), region = 20  ;;  %s153_s9 = sand.u32 (%p959_p3), 1, %s852_s16  }
  0x1d   : > { %s630_s10 = sshll.u32 (%p959_p3), %s864_s19, 5  ;;  %s618_s11 = sshll.u32 (%p959_p3), %s153_s9, 6 }
  0x1e   : > { %s158_s22 = sadd.s32 (%p959_p3), %s868_s20, %s630_s10  ;;  %s1128_s0 = sld [smem:[#allocation7_spill]] (%p959_p3) }
  0x1f   : > { %s621_s23 = sshll.u32 (%p959_p3), %s158_s22, 2  ;;  %s155_s26 = scalar_lea.vmem (%p959_p3), [#allocation3], %s618_s11 }
  0x24   : > { %s995_s29 = scalar_lea.vmem %s1128_s0, %s621_s23 }
  0x25   : > { %v177_v0 = vld [vmem:[%s995_s29] sm:$0xf]  ;;  %v179_v1 = vld [vmem:[%s995_s29 + $0x8] sm:$0xf]  ;;  %v181_v2 = vld [vmem:[%s995_s29 + $0x10] sm:$0xf] }
  0x26   : > { %178 = vst [vmem:[%s155_s26] sm:$0xf] %v177_v0  ;;  %v183_v3 = vld [vmem:[%s995_s29 + $0x18] sm:$0xf]  ;;  %v185_v4 = vld [vmem:[%s995_s29 + $0x20] sm:$0xf] }
  0x27   : > { %180 = vst [vmem:[%s155_s26 + $0x4] sm:$0xf] %v179_v1  ;;  %v187_v5 = vld [vmem:[%s995_s29 + $0x28] sm:$0xf]  ;;  %v189_v6 = vld [vmem:[%s995_s29 + $0x30] sm:$0xf] }
  0x28   : > { %182 = vst [vmem:[%s155_s26 + $0x8] sm:$0xf] %v181_v2  ;;  %v191_v7 = vld [vmem:[%s995_s29 + $0x38] sm:$0xf]  ;;  %v193_v8 = vld [vmem:[%s995_s29 + $0x40] sm:$0xf] }
  0x29   : > { %184 = vst [vmem:[%s155_s26 + $0xc] sm:$0xf] %v183_v3  ;;  %v195_v9 = vld [vmem:[%s995_s29 + $0x48] sm:$0xf]  ;;  %v197_v10 = vld [vmem:[%s995_s29 + $0x50] sm:$0xf] }
  0x2a   : > { %186 = vst [vmem:[%s155_s26 + $0x10] sm:$0xf] %v185_v4  ;;  %v199_v11 = vld [vmem:[%s995_s29 + $0x58] sm:$0xf]  ;;  %v201_v12 = vld [vmem:[%s995_s29 + $0x60] sm:$0xf] }
  0x2b   : > { %188 = vst [vmem:[%s155_s26 + $0x14] sm:$0xf] %v187_v5  ;;  %v203_v13 = vld [vmem:[%s995_s29 + $0x68] sm:$0xf]  ;;  %v205_v14 = vld [vmem:[%s995_s29 + $0x70] sm:$0xf] }
  0x2c   : > { %190 = vst [vmem:[%s155_s26 + $0x18] sm:$0xf] %v189_v6  ;;  %v207_v15 = vld [vmem:[%s995_s29 + $0x78] sm:$0xf] }
  0x2d   : > { %192 = vst [vmem:[%s155_s26 + $0x1c] sm:$0xf] %v191_v7 }
  0x2e   : > { %194 = vst [vmem:[%s155_s26 + $0x20] sm:$0xf] %v193_v8 }
  0x2f   : > { %196 = vst [vmem:[%s155_s26 + $0x24] sm:$0xf] %v195_v9 }
  0x30   : > { %198 = vst [vmem:[%s155_s26 + $0x28] sm:$0xf] %v197_v10 }
  0x31   : > { %200 = vst [vmem:[%s155_s26 + $0x2c] sm:$0xf] %v199_v11 }
  0x32   : > { %202 = vst [vmem:[%s155_s26 + $0x30] sm:$0xf] %v201_v12 }
  0x33   : > { %204 = vst [vmem:[%s155_s26 + $0x34] sm:$0xf] %v203_v13 }
  0x34   : > { %206 = vst [vmem:[%s155_s26 + $0x38] sm:$0xf] %v205_v14 }
  0x35   : > { %208 = vst [vmem:[%s155_s26 + $0x3c] sm:$0xf] %v207_v15 }
  0x36 PF: > { %p622_p0 = scmp.ge.s32.totalorder %s872_s21, 1  ;;  %p278_p1 = scmp.lt.s32.totalorder %s872_s21, 5 }
  0x38   : > { %p279_p2 = pnand %p622_p0, %p278_p1 }
  0x39   : > { %s285_s28 = sand.u32 (!%p279_p2), 1, %s848_s15   ;;  %s313_s5 = sand.u32 (!%p279_p2), 1, %s840_s13  }
  0x3a   : > { %282 = sbr.rel (%p279_p2) target bundleno = 271 (0x10f), region = 69  ;;  %s623_s9 = sshll.u32 (!%p279_p2), %s285_s28, 6 }
  0x3b   : > { %s624_s10 = sshll.u32 (!%p279_p2), %s856_s17, 4  ;;  %p322_p4 = scmp.lt.s32.totalorder (!%p279_p2), %s860_s18, 1 }
  0x3c   : > { %p317_p3 = scmp.lt.s32.totalorder (!%p279_p2), %s624_s10, 31  ;;  %s1031_s15 = scalar_lea.vmem (!%p279_p2), [#allocation3], %s623_s9 }
  0x3d   : > { %s1035_s28 = scalar_lea.vmem (!%p279_p2), [#allocation4], %s313_s5  ;;  %p626_p5 = scmp.ne.s32.totalorder (!%p279_p2), %s856_s17, 0 }
  0x3f   : > { %s1145_s10 = smov (!%p317_p3, %s624_s10), 31  ;;  %328 = sbr.rel (%p626_p5) target bundleno = 70 (0x46), region = 77 }
  0x40   : > { %s1020_s11 = scalar_select %p322_p4, %s860_s18, 1 }
  0x41   : > { %s625_s22 = sshll.u32 %s1145_s10, 3 }
  0x42   : > { %s1025_s4 = scalar_lea.vmem %s1121_s1, %s625_s22  ;;  %s324_s0 = scalar_lea.vmem %s1122_s2, %s1020_s11 }
  0x44   : > { %v874_v16 = vmov 0.0  }
  0x45   : > { %329 = vst [vmem:[#allocation2] sm:$0x1] %v874_v16 }
  0x46 PF: > { %v366_v17 = vld [vmem:[%s1025_s4 + $0x20] sm:$0xff]  ;;  %v364_v18 = vld [vmem:[%s1025_s4 + $0x10] sm:$0xff]  ;;  %v875_v20 = vmov 0   ;;  %v367_v21 = vld [vmem:[%s1025_s4 + $0x28] sm:$0xff]  ;;  %p627_p6 = scmp.ne.s32.totalorder %s856_s17, 1 }
  0x47   : > { %v362_v19 = vld [vmem:[%s1025_s4] sm:$0xff]  ;;  %761 = vset.pattern.permute.xlu2 %v875_v20  ;;  %760 = vset.pattern.permute.xlu1 %v875_v20  ;;  %v365_v22 = vld [vmem:[%s1025_s4 + $0x18] sm:$0xff]  ;;  %v363_v23 = vld [vmem:[%s1025_s4 + $0x8] sm:$0xff] }
  0x48   : > { %759 = vset.pattern.permute.xlu0 %v875_v20  ;;  %401 = vperm.xlu2 %761, %v366_v17   ;;  %v370_v24 = vld [vmem:[%s1025_s4 + $0x40] sm:$0xff]  ;;  %v369_v25 = vld [vmem:[%s1025_s4 + $0x38] sm:$0xff]  ;;  %v368_v26 = vld [vmem:[%s1025_s4 + $0x30] sm:$0xff] }
  0x49   : > { %391 = vperm.xlu1 %760, %v364_v18   ;;  %381 = vperm.xlu0 %759, %v362_v19   ;;  %v373_v27 = vld [vmem:[%s1025_s4 + $0x58] sm:$0xff]  ;;  %v372_v28 = vld [vmem:[%s1025_s4 + $0x50] sm:$0xff]  ;;  %v371_v29 = vld [vmem:[%s1025_s4 + $0x48] sm:$0xff] }
  0x4a   : > { %v376_v30 = vld [vmem:[%s1025_s4 + $0x70] sm:$0xff]  ;;  %v375_v31 = vld [vmem:[%s1025_s4 + $0x68] sm:$0xff]  ;;  %v374_v32 = vld [vmem:[%s1025_s4 + $0x60] sm:$0xff] }
  0x4b   : > { %v377_v33 = vld [vmem:[%s1025_s4 + $0x78] sm:$0xff]  ;;  %v632_v37 = vld [vmem:[%s1031_s15] sm:$0xff]   ;;  %v663_v38 = vld [vmem:[%s1031_s15 + $0x8] sm:$0xff]  }
  0x4c   : > { %v633_v40 = vunpack.c.l.bf16 %v632_v37  ;;  %v634_v41 = vunpack.c.h.bf16 %v632_v37  ;;  %v637_v42 = vunpack.c.l.bf16 %v663_v38  ;;  %v664_v43 = vld [vmem:[%s1031_s15 + $0x10] sm:$0xff]   ;;  %v638_v47 = vunpack.c.h.bf16 %v663_v38  ;;  %v665_v52 = vld [vmem:[%s1031_s15 + $0x18] sm:$0xff]   ;;  %v666_v60 = vld [vmem:[%s1031_s15 + $0x20] sm:$0xff]  }
  0x4d   : > { %v641_v49 = vunpack.c.l.bf16 %v664_v43  ;;  %v642_v53 = vunpack.c.h.bf16 %v664_v43  ;;  %v645_v59 = vunpack.c.l.bf16 %v665_v52  ;;  %v646_v0 = vunpack.c.h.bf16 %v665_v52  ;;  %v667_v8 = vld [vmem:[%s1031_s15 + $0x28] sm:$0xff]   ;;  %v668_v17 = vld [vmem:[%s1031_s15 + $0x30] sm:$0xff]  }
  0x4e   : > { %v649_v2 = vunpack.c.l.bf16 %v666_v60  ;;  %v650_v7 = vunpack.c.h.bf16 %v666_v60  ;;  %v653_v11 = vunpack.c.l.bf16 %v667_v8  ;;  %v654_v18 = vunpack.c.h.bf16 %v667_v8 }
  0x50   : > { %406 = vperm.xlu2 %761, %v367_v21  }
  0x51   : > { %396 = vperm.xlu1 %760, %v365_v22   ;;  %386 = vperm.xlu0 %759, %v363_v23   ;;  %v657_v22 = vunpack.c.l.bf16 %v668_v17 }
  0x58   : > { %421 = vperm.xlu2 %761, %v370_v24   ;;  %v658_v24 = vunpack.c.h.bf16 %v668_v17 }
  0x59   : > { %416 = vperm.xlu1 %760, %v369_v25   ;;  %411 = vperm.xlu0 %759, %v368_v26   ;;  %v669_v25 = vld [vmem:[%s1031_s15 + $0x38] sm:$0xff]  }
  0x60   : > { %436 = vperm.xlu2 %761, %v373_v27  }
  0x61   : > { %431 = vperm.xlu1 %760, %v372_v28   ;;  %426 = vperm.xlu0 %759, %v371_v29  }
  0x68   : > { %451 = vperm.xlu2 %761, %v376_v30   ;;  %v661_v30 = vunpack.c.l.bf16 %v669_v25 }
  0x69   : > { %446 = vperm.xlu1 %760, %v375_v31   ;;  %441 = vperm.xlu0 %759, %v374_v32  }
  0x71   : > { %456 = vperm.xlu0 %759, %v377_v33  }
  0xa2   : > { %v402_v34 = vpop.permute.xlu2 %401 }
  0xa3   : > { %v463_v56 = vmul.f32 %v641_v49, %v402_v34 }
  0xaa   : > { %v407_v39 = vpop.permute.xlu2 %406 }
  0xab   : > { %v464_v63 = vmul.f32 %v642_v53, %v407_v39 }
  0xb2   : > { %v422_v57 = vpop.permute.xlu2 %421 }
  0xb3   : > { %v467_v9 = vmul.f32 %v649_v2, %v422_v57 }
  0xba   : > { %v437_v16 = vpop.permute.xlu2 %436 }
  0xbb   : > { %v392_v35 = vpop.permute.xlu1 %391  ;;  %v382_v36 = vpop.permute.xlu0 %381  ;;  %v470_v23 = vmul.f32 %v654_v18, %v437_v16 }
  0xbc   : > { %v459_v46 = vmul.f32 %v633_v40, %v382_v36  ;;  %v461_v50 = vmul.f32 %v637_v42, %v392_v35  ;;  %v662_v35 = vunpack.c.h.bf16 %v669_v25 }
  0xc2   : > { %v452_v33 = vpop.permute.xlu2 %451 }
  0xc3   : > { %v397_v44 = vpop.permute.xlu1 %396  ;;  %v387_v45 = vpop.permute.xlu0 %386  ;;  %v473_v36 = vmul.f32 %v661_v30, %v452_v33 }
  0xc4   : > { %v460_v48 = vmul.f32 %v634_v41, %v387_v45  ;;  %v462_v54 = vmul.f32 %v638_v47, %v397_v44 }
  0xc6   : > { %v475_v51 = vadd.f32 %v460_v48, %v459_v46  ;;  %v378_v46 = vld [vmem:[#allocation2] sm:$0x1] }
  0xc8   : > { %v476_v55 = vadd.f32 %v475_v51, %v461_v50 }
  0xca   : > { %v477_v58 = vadd.f32 %v476_v55, %v462_v54 }
  0xcb   : > { %v417_v61 = vpop.permute.xlu1 %416  ;;  %v412_v62 = vpop.permute.xlu0 %411 }
  0xcc   : > { %v478_v1 = vadd.f32 %v477_v58, %v463_v56  ;;  %v465_v3 = vmul.f32 %v645_v59, %v412_v62  ;;  %v466_v5 = vmul.f32 %v646_v0, %v417_v61 }
  0xce   : > { %v479_v4 = vadd.f32 %v478_v1, %v464_v63 }
  0xd0   : > { %v480_v6 = vadd.f32 %v479_v4, %v465_v3 }
  0xd2   : > { %v481_v10 = vadd.f32 %v480_v6, %v466_v5 }
  0xd3   : > { %v432_v12 = vpop.permute.xlu1 %431  ;;  %v427_v13 = vpop.permute.xlu0 %426 }
  0xd4   : > { %v468_v14 = vmul.f32 %v650_v7, %v427_v13  ;;  %v482_v15 = vadd.f32 %v481_v10, %v467_v9  ;;  %v469_v19 = vmul.f32 %v653_v11, %v432_v12 }
  0xd6   : > { %v483_v20 = vadd.f32 %v482_v15, %v468_v14 }
  0xd8   : > { %v484_v21 = vadd.f32 %v483_v20, %v469_v19 }
  0xda   : > { %v485_v29 = vadd.f32 %v484_v21, %v470_v23 }
  0xdb   : > { %v447_v26 = vpop.permute.xlu1 %446  ;;  %v442_v27 = vpop.permute.xlu0 %441 }
  0xdc   : > { %v471_v28 = vmul.f32 %v657_v22, %v442_v27  ;;  %v472_v31 = vmul.f32 %v658_v24, %v447_v26 }
  0xde   : > { %v486_v32 = vadd.f32 %v485_v29, %v471_v28 }
  0xe0   : > { %v487_v34 = vadd.f32 %v486_v32, %v472_v31 }
  0xe2   : > { %v488_v39 = vadd.f32 %v487_v34, %v473_v36 }
  0xe3   : > { %v457_v37 = vpop.permute.xlu0 %456 }
  0xe4   : > { %v474_v38 = vmul.f32 %v662_v35, %v457_v37 }
  0xe6   : > { %v489_v40 = vadd.f32 %v488_v39, %v474_v38 }
  0xe8   : > { %v490_v41 = vrot.slane %v489_v40, 4 }
  0xea   : > { %v491_v42 = vadd.f32 %v490_v41, %v489_v40 }
  0xec   : > { %v492_v43 = vrot.slane %v491_v42, 2 }
  0xee   : > { %v493_v44 = vadd.f32 %v492_v43, %v491_v42 }
  0xf0   : > { %v494_v45 = vrot.slane %v493_v44, 1 }
  0xf2   : > { %v495_v47 = vadd.f32 %v494_v45, %v493_v44  ;;  %501 = sbr.rel (%p627_p6) target bundleno = 257 (0x101), region = 81 }
  0xf4   : > { %v496_v48 = vadd.f32 %v495_v47, %v378_v46 }
  0xf6   : > { %497 = vst [vmem:[#allocation2] sm:$0x1] %v496_v48 }
  0xf7   : > { %v503_v50 = vld [vmem:[%s324_s0] sm:$0x1] }
  0xfd   : > { %v502_v49 = vld [vmem:[#allocation2] sm:$0x1] }
  0xfe   : > { %v504_v51 = vmul.f32 %v503_v50, %v502_v49 }
 0x100   : > { %505 = vst [vmem:[%s1035_s28] sm:$0x1] %v504_v51 }
 0x101 PF: > { %s515_s17 = scalar_lea.hbm %s1123_s3, %s860_s18  ;;  %s517_s27 = sshll.u32 %s1035_s28, 4  ;;  %s518_s27 = int_to_ptr.vmem [resolvable:$true] %s517_s27 }
 0x102   : > { %s519_s4 = sshll.u32 %s515_s17, 4  ;;  %s507_s29 = scalar_lea.sflag [#allocation5], %s313_s5  ;;  %s520_s4 = int_to_ptr.hbm [resolvable:$true] %s519_s4 }
 0x103   : > { %s776_s11 = sshra.s32 %s520_s4, 4  ;;  %s782_s9 = scalar_lea.hbm %s1123_s3, 2  ;;  %s777_s11 = int_to_ptr.hbm [resolvable:$true] %s776_s11 }
 0x104   : > { %s778_s0 = scalar_lea.hbm %s777_s11, 1  ;;  %p783_p11 = scmp.lt.s32.totalorder %s777_s11, %s1123_s3 }
 0x105   : > { %p779_p8 = scmp.ne.s32.totalorder %s777_s11, %s778_s0  ;;  %p784_p13 = scmp.lt.s32.totalorder %s782_s9, %s778_s0 }
 0x107   : > { %p780_p9 = pnand %p779_p8, %p968_p7  ;;  %p785_p0 = por %p784_p13, %p783_p11 }
 0x109   : > { %p781_p10 = pneg %p780_p9 }
 0x10b   : > { %p786_p1 = pnand %p785_p0, %p781_p10 }
 0x10d   : > { %789 = shalt.err (!%p786_p1)
}
 0x10e   : > { %670 = dma.vmem_to_hbm [thread:$0]  (%p968_p7), %s518_s27, 16, %s520_s4, %s507_s29  }
 0x10f PF: > { %p676_p2 = scmp.ge.s32.totalorder %s872_s21, 2  ;;  %s531_s18 = sand.u32 1, %s836_s12  }
 0x110   : > { %s532_s5 = scalar_lea.sflag [#allocation5], %s531_s18 }
 0x111   : > { %p673_p3 = pnand %p676_p2, %p976_p12 }
 0x113   : > { %p674_p4 = pneg %p673_p3 }
 0x115   : > { %831 = dma.done.wait (%p674_p4), %s532_s5, 16  }
 0x116   : > { %833 = vsyncadd (%p674_p4), %s532_s5, 4294967280  ;;  %s16_s21 = sadd.s32 1, %s872_s21   ;;  %s1129_s12 = smov %s840_s13 }
 0x117   : > { %p13_p5 = scmp.ge.s32.totalorder %s16_s21, 6   ;;  %s1130_s13 = smov %s844_s14 }
 0x118   : > { %s1131_s14 = smov %s981_s7  ;;  %s1132_s15 = smov %s852_s16 }
 0x119   : > { %s1133_s16 = smov %s984_s8  ;;  %s1134_s17 = smov %s864_s19 }
 0x11a   : > { %s1135_s18 = smov %s868_s20  ;;  %s1136_s19 = smov %s1139_s24 }
 0x11b   : > { %s1137_s20 = smov %s1143_s25  ;;  %15 = sbr.rel (!%p13_p5) target bundleno = 8 (0x8), region = 127 }
 0x120   :  { %537 = vsyncpa [#allocation5], 1 }
 0x121   :  { %539 = vsyncpa [#allocation5 + $0x1], 1 }

</bundles_post_ra>
